<compile_context>
chip_gen: v6e
topology: v6e:2x2x1
jax: 0.10.0
libtpu: 0.0.40
codegen_flags: <defaults>
</compile_context>

<pallas_src>
import jax
import jax.numpy as jnp
from jax.experimental import pallas as pl
from jax.experimental.pallas import tpu as pltpu


def _critic_kernel(x_ref, w1_ref, b1_ref, w2_ref, b2_ref, w3_ref, b3_ref, o_ref):
    # Hoisted single loads of the small resident tensors (f32).
    b1 = b1_ref[...]                    # (fc1, 1)
    b2 = b2_ref[...]                    # (fc2, 1)
    w3 = w3_ref[...]                    # (fc2, 1) value-head column
    b3 = b3_ref[...]                    # (1, 1)

    # Layer 1: (fc1, in) @ (in, TB) -> (fc1, TB).  bf16 MXU, f32 accumulation.
    x = x_ref[...].astype(jnp.bfloat16)
    h1 = jnp.dot(w1_ref[...], x, preferred_element_type=jnp.float32)
    h1 = jnp.maximum(h1 + b1, 0.0)

    # Layer 2: (fc2, fc1) @ (fc1, TB) -> (fc2, TB).  bf16 MXU, f32 accumulation.
    h2 = jnp.dot(w2_ref[...], h1.astype(jnp.bfloat16),
                 preferred_element_type=jnp.float32)
    h2 = jnp.maximum(h2 + b2, 0.0)

    # Value head (out_dim = 1): f32 VPU multiply + sublane reduction (XLU),
    # producing a lane-dense (1, TB) row -> unmasked stores.
    v = jnp.sum(h2 * w3, axis=0, keepdims=True)
    o_ref[...] = (v + b3).astype(o_ref.dtype)


def _round_up(x, m):
    return ((x + m - 1) // m) * m


_VMEM_BUDGET = 40 * 1024 * 1024   # conservative vs v7x's 64 MiB physical VMEM


def _vmem_bytes(in_dim, fc1, fc2, tb):
    """Rough per-step VMEM estimate: double-buffered streams + activations + weights."""
    streamed = 2 * (in_dim * tb * 4) + 2 * (8 * tb * 4)       # x_T + (sublane-padded) out
    acts = (fc1 + fc2) * tb * 4 + (fc1 + in_dim) * tb * 2      # h1/h2 f32 + bf16 copies
    weights = (fc1 * in_dim + fc2 * fc1) * 2 + 4 * fc2 * 128 * 4
    return streamed + acts + weights


def _select_tb(batch, in_dim, fc1, fc2, tb):
    b_lanes = _round_up(batch, 128)                  # lane-dense minimum tile
    tb = _round_up(max(tb, 128), 128)
    # Guarantee >= 2 grid steps when there is enough batch so both v7x
    # TensorCores get work under dimension_semantics=("parallel",).
    if 128 < b_lanes <= 2 * tb:
        tb = _round_up((b_lanes + 1) // 2, 128)
    tb = min(tb, b_lanes)
    # Shrink until the VMEM estimate fits the budget (activations dominate).
    while tb > 128 and _vmem_bytes(in_dim, fc1, fc2, tb) > _VMEM_BUDGET:
        tb = _round_up(tb // 2, 128)
    return tb


def critic_forward(state, params, *, tb=4096):
    """state: (B, in_dim) f32. params: dict of pre-laid-out weights/biases."""
    w1, b1, w2, b2, w3, b3 = (
        params["w1"], params["b1"],
        params["w2"], params["b2"],
        params["w3"], params["b3"],
    )
    B, in_dim = state.shape
    fc1, fc2 = w1.shape[0], w2.shape[0]

    TB = _select_tb(B, in_dim, fc1, fc2, tb)
    B_pad = _round_up(B, TB)

    # Feature-major stream: one wrapper-side transpose (layout plumbing only).
    x_t = state.T
    if B_pad != B:
        x_t = jnp.pad(x_t, ((0, 0), (0, B_pad - B)))

    grid = (B_pad // TB,)
    resident = lambda arr: pl.BlockSpec(arr.shape, lambda i: (0, 0))

    flops = 2 * B_pad * (in_dim * fc1 + fc1 * fc2 + fc2)
    bytes_accessed = (B_pad * in_dim * 4 + B_pad * 4
                      + (fc1 * in_dim + fc2 * fc1) * 2
                      + (fc1 + fc2 + fc2 + 1) * 4)

    out = pl.pallas_call(
        _critic_kernel,
        out_shape=jax.ShapeDtypeStruct((1, B_pad), jnp.float32),
        grid=grid,
        in_specs=[
            pl.BlockSpec((in_dim, TB), lambda i: (0, i)),     # streamed x_T
            resident(w1), resident(b1),
            resident(w2), resident(b2),
            resident(w3), resident(b3),
        ],
        out_specs=pl.BlockSpec((1, TB), lambda i: (0, i)),    # lane-dense value row
        compiler_params=pltpu.CompilerParams(
            dimension_semantics=("parallel",),                # 2 TCs on v7x
            vmem_limit_bytes=min(
                max(2 * _vmem_bytes(in_dim, fc1, fc2, TB), 16 * 1024 * 1024),
                56 * 1024 * 1024),
        ),
        cost_estimate=pl.CostEstimate(
            flops=flops, transcendentals=0, bytes_accessed=bytes_accessed),
    )(x_t, w1, b1, w2, b2, w3, b3)

    # Padded columns hold bias/ReLU garbage; they are sliced off here.
    return out[:, :B].T


def init_critic_params(key, input_dim, fc1_dims=256, fc2_dims=256):
    """nn.Linear-style U(-1/sqrt(fan_in), 1/sqrt(fan_in)) init, laid out
    feature-major for the kernel: w1 (fc1, in) / w2 (fc2, fc1) in bf16 (MXU
    LHS), biases as (out, 1) f32 columns, value head w3 as a (fc2, 1) f32
    column and b3 as (1, 1) f32."""
    def linear(k, fan_in, fan_out):
        kw, kb = jax.random.split(k)
        bound = 1.0 / (fan_in ** 0.5)
        w = jax.random.uniform(kw, (fan_out, fan_in), jnp.float32, -bound, bound)
        b = jax.random.uniform(kb, (fan_out, 1), jnp.float32, -bound, bound)
        return w, b

    k1, k2, k3 = jax.random.split(key, 3)
    w1, b1 = linear(k1, input_dim, fc1_dims)
    w2, b2 = linear(k2, fc1_dims, fc2_dims)
    w3, b3 = linear(k3, fc2_dims, 1)
    return {
        "w1": w1.astype(jnp.bfloat16), "b1": b1,
        "w2": w2.astype(jnp.bfloat16), "b2": b2,
        "w3": w3.T,                    "b3": b3,   # (fc2,1) f32 col, (1,1) f32
    }


def critic_forward_ref(state, params):
    """Pure-JAX reference with the same bf16-matmul / f32-accum semantics."""
    x = state.astype(jnp.bfloat16)
    h1 = jnp.maximum(
        jnp.dot(x, params["w1"].T, preferred_element_type=jnp.float32)
        + params["b1"].T, 0.0)
    h2 = jnp.maximum(
        jnp.dot(h1.astype(jnp.bfloat16), params["w2"].T,
                preferred_element_type=jnp.float32)
        + params["b2"].T, 0.0)
    return jnp.dot(h2, params["w3"]) + params["b3"].T


# TODO(synk): Adam optimizer and save/load_checkpoint from the PyTorch module
# are training/IO infrastructure with no forward-pass Pallas equivalent.

if __name__ == "__main__":
    key = jax.random.PRNGKey(0)
    k_params, k_state, k_state2 = jax.random.split(key, 3)

    input_dim = 8      # input_dims = (8,) for the PPO critic

    params = init_critic_params(k_params, input_dim)

    # Small batch (single 128-wide lane-dense tile).
    batch = 8
    state = jax.random.normal(k_state, (batch, input_dim), jnp.float32)
    value = jax.block_until_ready(critic_forward(state, params))
    ref = critic_forward_ref(state, params)
    assert value.shape == (batch, 1)
    assert jnp.allclose(value, ref, atol=5e-3, rtol=5e-3)

    # Batch that forces padding and a 2-step grid (exercises the v7x
    # >=2-grid-step / megacore path and the output slicing).
    batch2 = 200
    state2 = jax.random.normal(k_state2, (batch2, input_dim), jnp.float32)
    value2 = jax.block_until_ready(critic_forward(state2, params))
    ref2 = critic_forward_ref(state2, params)
    assert value2.shape == (batch2, 1)
    assert jnp.allclose(value2, ref2, atol=5e-3, rtol=5e-3)

    print("KERNEL_OK")
</pallas_src>

<mosaic_0001>
module attributes {stable_mosaic.version = 11 : i64} {
  func.func @_critic_kernel(%arg0: i32, %arg1: memref<8x128xf32, #tpu.memory_space<vmem>>, %arg2: memref<256x8xbf16, #tpu.memory_space<vmem>>, %arg3: memref<256x1xf32, #tpu.memory_space<vmem>>, %arg4: memref<256x256xbf16, #tpu.memory_space<vmem>>, %arg5: memref<256x1xf32, #tpu.memory_space<vmem>>, %arg6: memref<256x1xf32, #tpu.memory_space<vmem>>, %arg7: memref<1x1xf32, #tpu.memory_space<vmem>>, %arg8: memref<1x128xf32, #tpu.memory_space<vmem>>) attributes {dimension_semantics = [#tpu.dimension_semantics<parallel>], iteration_bounds = array<i64: 1>, scalar_prefetch = 0 : i64, scratch_operands = 0 : i64, tpu.core_type = #tpu.core_type<tc>, window_params = [{transform_indices = @transform_0, window_bounds = array<i64: 8, 128>}, {pipeline_mode = #tpu.pipeline_mode<synchronous>, transform_indices = @transform_1, window_bounds = array<i64: 256, 8>}, {pipeline_mode = #tpu.pipeline_mode<synchronous>, transform_indices = @transform_2, window_bounds = array<i64: 256, 1>}, {pipeline_mode = #tpu.pipeline_mode<synchronous>, transform_indices = @transform_3, window_bounds = array<i64: 256, 256>}, {pipeline_mode = #tpu.pipeline_mode<synchronous>, transform_indices = @transform_4, window_bounds = array<i64: 256, 1>}, {pipeline_mode = #tpu.pipeline_mode<synchronous>, transform_indices = @transform_5, window_bounds = array<i64: 256, 1>}, {pipeline_mode = #tpu.pipeline_mode<synchronous>, transform_indices = @transform_6, window_bounds = array<i64: 1, 1>}, {transform_indices = @transform_7, window_bounds = array<i64: 1, 128>}]} {
    %c0 = arith.constant 0 : index
    %c0_0 = arith.constant 0 : index
    %0 = vector.load %arg3[%c0, %c0_0] : memref<256x1xf32, #tpu.memory_space<vmem>>, vector<256x1xf32>
    %c0_1 = arith.constant 0 : index
    %c0_2 = arith.constant 0 : index
    %1 = vector.load %arg5[%c0_1, %c0_2] : memref<256x1xf32, #tpu.memory_space<vmem>>, vector<256x1xf32>
    %c0_3 = arith.constant 0 : index
    %c0_4 = arith.constant 0 : index
    %2 = vector.load %arg6[%c0_3, %c0_4] : memref<256x1xf32, #tpu.memory_space<vmem>>, vector<256x1xf32>
    %c0_5 = arith.constant 0 : index
    %c0_6 = arith.constant 0 : index
    %3 = vector.load %arg7[%c0_5, %c0_6] : memref<1x1xf32, #tpu.memory_space<vmem>>, vector<1x1xf32>
    %c0_7 = arith.constant 0 : index
    %c0_8 = arith.constant 0 : index
    %4 = vector.load %arg1[%c0_7, %c0_8] : memref<8x128xf32, #tpu.memory_space<vmem>>, vector<8x128xf32>
    %5 = arith.truncf %4 : vector<8x128xf32> to vector<8x128xbf16>
    %c0_9 = arith.constant 0 : index
    %c0_10 = arith.constant 0 : index
    %6 = vector.load %arg2[%c0_9, %c0_10] : memref<256x8xbf16, #tpu.memory_space<vmem>>, vector<256x8xbf16>
    %cst = arith.constant dense<0.000000e+00> : vector<256x128xf32>
    %7 = tpu.matmul %6, %5, %cst {dimension_numbers = #tpu.dot_dimension_numbers<[1], [0], [0], [1], [0, 0, 1, 1], [], []>} : vector<256x8xbf16>, vector<8x128xbf16>, vector<256x128xf32> -> vector<256x128xf32>
    %8 = vector.broadcast %0 : vector<256x1xf32> to vector<256x128xf32>
    %9 = arith.addf %7, %8 : vector<256x128xf32>
    %cst_11 = arith.constant 0.000000e+00 : f32
    %10 = vector.broadcast %cst_11 : f32 to vector<256x128xf32>
    %11 = arith.maximumf %9, %10 : vector<256x128xf32>
    %c0_12 = arith.constant 0 : index
    %c0_13 = arith.constant 0 : index
    %12 = vector.load %arg4[%c0_12, %c0_13] : memref<256x256xbf16, #tpu.memory_space<vmem>>, vector<256x256xbf16>
    %13 = arith.truncf %11 : vector<256x128xf32> to vector<256x128xbf16>
    %cst_14 = arith.constant dense<0.000000e+00> : vector<256x128xf32>
    %14 = tpu.matmul %12, %13, %cst_14 {dimension_numbers = #tpu.dot_dimension_numbers<[1], [0], [0], [1], [0, 0, 1, 1], [], []>} : vector<256x256xbf16>, vector<256x128xbf16>, vector<256x128xf32> -> vector<256x128xf32>
    %15 = vector.broadcast %1 : vector<256x1xf32> to vector<256x128xf32>
    %16 = arith.addf %14, %15 : vector<256x128xf32>
    %cst_15 = arith.constant 0.000000e+00 : f32
    %17 = vector.broadcast %cst_15 : f32 to vector<256x128xf32>
    %18 = arith.maximumf %16, %17 : vector<256x128xf32>
    %19 = vector.broadcast %2 : vector<256x1xf32> to vector<256x128xf32>
    %20 = arith.mulf %18, %19 : vector<256x128xf32>
    %cst_16 = arith.constant dense<0.000000e+00> : vector<128xf32>
    %21 = vector.multi_reduction <add>, %20, %cst_16 [0] : vector<256x128xf32> to vector<128xf32>
    %22 = vector.shape_cast %21 : vector<128xf32> to vector<1x128xf32>
    %23 = vector.broadcast %3 : vector<1x1xf32> to vector<1x128xf32>
    %24 = arith.addf %22, %23 : vector<1x128xf32>
    %c0_17 = arith.constant 0 : index
    %c0_18 = arith.constant 0 : index
    %25 = vector.load %arg8[%c0_17, %c0_18] : memref<1x128xf32, #tpu.memory_space<vmem>>, vector<1x128xf32>
    tpu.vector_store %arg8[%c0_17, %c0_18], %24 {strides = array<i32>} : memref<1x128xf32, #tpu.memory_space<vmem>>, vector<1x128xf32>,
    return
  }
  func.func @transform_0(%arg0: i32) -> (i32, i32) {
    %c0_i32 = arith.constant 0 : i32
    %c0_i32_0 = arith.constant 0 : i32
    return %c0_i32, %arg0 : i32, i32
  }
  func.func @transform_1(%arg0: i32) -> (i32, i32) {
    %c0_i32 = arith.constant 0 : i32
    %c0_i32_0 = arith.constant 0 : i32
    %c0_i32_1 = arith.constant 0 : i32
    return %c0_i32, %c0_i32_0 : i32, i32
  }
  func.func @transform_2(%arg0: i32) -> (i32, i32) {
    %c0_i32 = arith.constant 0 : i32
    %c0_i32_0 = arith.constant 0 : i32
    %c0_i32_1 = arith.constant 0 : i32
    return %c0_i32, %c0_i32_0 : i32, i32
  }
  func.func @transform_3(%arg0: i32) -> (i32, i32) {
    %c0_i32 = arith.constant 0 : i32
    %c0_i32_0 = arith.constant 0 : i32
    %c0_i32_1 = arith.constant 0 : i32
    return %c0_i32, %c0_i32_0 : i32, i32
  }
  func.func @transform_4(%arg0: i32) -> (i32, i32) {
    %c0_i32 = arith.constant 0 : i32
    %c0_i32_0 = arith.constant 0 : i32
    %c0_i32_1 = arith.constant 0 : i32
    return %c0_i32, %c0_i32_0 : i32, i32
  }
  func.func @transform_5(%arg0: i32) -> (i32, i32) {
    %c0_i32 = arith.constant 0 : i32
    %c0_i32_0 = arith.constant 0 : i32
    %c0_i32_1 = arith.constant 0 : i32
    return %c0_i32, %c0_i32_0 : i32, i32
  }
  func.func @transform_6(%arg0: i32) -> (i32, i32) {
    %c0_i32 = arith.constant 0 : i32
    %c0_i32_0 = arith.constant 0 : i32
    %c0_i32_1 = arith.constant 0 : i32
    return %c0_i32, %c0_i32_0 : i32, i32
  }
  func.func @transform_7(%arg0: i32) -> (i32, i32) {
    %c0_i32 = arith.constant 0 : i32
    %c0_i32_0 = arith.constant 0 : i32
    return %c0_i32, %arg0 : i32, i32
  }
}

</mosaic_0001>

<bundles_post_ra>
// kernel: tpu_custom_call.1
= control target key start
LH: loop header
LB: loop body
LE: loop exit
PB: predicated region body
PF: predicated region fallthrough
CT: control target
= control target key end

     0   :  { %s2581_s0 = inlined_call_operand.vmem [shape: f32[8,128], index: 0, kind: input, shape index: {}]   ;;  %s2582_s1 = inlined_call_operand.vmem [shape: bf16[256,8], index: 1, kind: input, shape index: {}]   ;;  %s2583_s2 = inlined_call_operand.vmem [shape: f32[256,1], index: 2, kind: input, shape index: {}]   ;;  %s2584_s3 = inlined_call_operand.vmem [shape: bf16[256,256], index: 3, kind: input, shape index: {}]   ;;  %s2585_s4 = inlined_call_operand.vmem [shape: f32[256,1], index: 4, kind: input, shape index: {}]   ;;  %s2586_s5 = inlined_call_operand.vmem [shape: f32[256,1], index: 5, kind: input, shape index: {}]   ;;  %s2587_s6 = inlined_call_operand.<no memory space> [shape: f32[1,1], index: 6, kind: input, shape index: {}]   ;;  %s2588_s7 = inlined_call_operand.hbm [shape: f32[1,128], index: 7, kind: output, shape index: {}]  }
   0x1   :  { %v12_v0 = vstv %s2587_s6 }
   0x2   :  { %13 = vst [vmem:[#allocation2] sm:$0x1] %v12_v0 }
   0x3   :  { %v60_v1 = vld [vmem:[%s2583_s2 + $0xf0] sm:$0xff]  ;;  %v127_v3 = vld [vmem:[%s2581_s0] sm:$0xff]  ;;  %vm450_vm0 = vcmask 1043456   ;;  %vm401_vm1 = vcmask 64512   ;;  %v1796_v4 = vmov 0   ;;  %v61_v7 = vld [vmem:[%s2583_s2 + $0xf8] sm:$0xff] }
   0x4   :  { %v44_v2 = vld [vmem:[%s2583_s2 + $0x70] sm:$0xff]  ;;  %1709 = vset.pattern.permute.xlu1 %v1796_v4  ;;  %1708 = vset.pattern.permute.xlu0 %v1796_v4  ;;  %v128_v5 = vpack.c.bf16 %v127_v3, %v127_v3  ;;  %v1710_v6 = vld [vmem:[%s2582_s1] sm:$0xff]   ;;  %v45_v9 = vld [vmem:[%s2583_s2 + $0x78] sm:$0xff] }
   0x5   :  { %313 = vperm.xlu0 %1708, %v60_v1   ;;  %233 = vperm.xlu1 %1709, %v44_v2   ;;  %v1711_v10 = vld [vmem:[%s2582_s1 + $0x8] sm:$0xff]   ;;  %v1712_v11 = vld [vmem:[%s2582_s1 + $0x10] sm:$0xff]   ;;  %v58_v12 = vld [vmem:[%s2583_s2 + $0xe0] sm:$0xff] }
   0x6   :  { %1705 = vmatprep.subr.msk.bf16.mxu0 %vm450_vm0, %v128_v5  ;;  %v452_v8 = vsel %vm450_vm0, %v128_v5, 0  ;;  %1657 = vmatprep.mubr.msk.bf16.mxu0 %vm401_vm1, %v1710_v6  ;;  %v59_v13 = vld [vmem:[%s2583_s2 + $0xe8] sm:$0xff]  ;;  %v42_v15 = vld [vmem:[%s2583_s2 + $0x60] sm:$0xff]  ;;  %v1713_v16 = vld [vmem:[%s2582_s1 + $0x18] sm:$0xff]  }
   0x7   :  { %1656 = vmatpush3.bf16.msra.mxu0 %v452_v8  ;;  %v43_v14 = vld [vmem:[%s2583_s2 + $0x68] sm:$0xff]  ;;  %v1714_v17 = vld [vmem:[%s2582_s1 + $0x20] sm:$0xff]   ;;  %v57_v18 = vld [vmem:[%s2583_s2 + $0xd8] sm:$0xff] }
   0x8   :  { %v56_v19 = vld [vmem:[%s2583_s2 + $0xd0] sm:$0xff]  ;;  %v41_v20 = vld [vmem:[%s2583_s2 + $0x58] sm:$0xff]  ;;  %v1715_v22 = vld [vmem:[%s2582_s1 + $0x28] sm:$0xff]  }
   0x9   :  { %318 = vperm.xlu0 %1708, %v61_v7   ;;  %238 = vperm.xlu1 %1709, %v45_v9   ;;  %v40_v21 = vld [vmem:[%s2583_s2 + $0x50] sm:$0xff]  ;;  %v55_v24 = vld [vmem:[%s2583_s2 + $0xc8] sm:$0xff]  ;;  %v54_v25 = vld [vmem:[%s2583_s2 + $0xc0] sm:$0xff] }
   0xa   :  { %1658 = vmatmul.mubr.msk.bf16.vlgmr.msra.gmra.mxu0 %vm401_vm1, %v1711_v10  ;;  %v1716_v23 = vld [vmem:[%s2582_s1 + $0x30] sm:$0xff]   ;;  %v39_v26 = vld [vmem:[%s2583_s2 + $0x48] sm:$0xff]  ;;  %v38_v27 = vld [vmem:[%s2583_s2 + $0x40] sm:$0xff] }
   0xb   :  { %1661 = vmatprep.mubr.msk.bf16.mxu0 %vm401_vm1, %v1712_v11  ;;  %v1717_v28 = vld [vmem:[%s2582_s1 + $0x38] sm:$0xff]   ;;  %v1718_v29 = vld [vmem:[%s2582_s1 + $0x40] sm:$0xff]   ;;  %v52_v31 = vld [vmem:[%s2583_s2 + $0xb0] sm:$0xff] }
   0xc   :  { %v53_v30 = vld [vmem:[%s2583_s2 + $0xb8] sm:$0xff]  ;;  %v36_v33 = vld [vmem:[%s2583_s2 + $0x30] sm:$0xff]  ;;  %v1719_v34 = vld [vmem:[%s2582_s1 + $0x48] sm:$0xff]  }
   0xd   :  { %303 = vperm.xlu0 %1708, %v58_v12   ;;  %308 = vperm.xlu1 %1709, %v59_v13   ;;  %v37_v32 = vld [vmem:[%s2583_s2 + $0x38] sm:$0xff]  ;;  %v1720_v35 = vld [vmem:[%s2582_s1 + $0x50] sm:$0xff]   ;;  %v51_v36 = vld [vmem:[%s2583_s2 + $0xa8] sm:$0xff] }
   0xe   :  { %v50_v37 = vld [vmem:[%s2583_s2 + $0xa0] sm:$0xff]  ;;  %v35_v38 = vld [vmem:[%s2583_s2 + $0x28] sm:$0xff]  ;;  %v1721_v40 = vld [vmem:[%s2582_s1 + $0x58] sm:$0xff]  }
   0xf   :  { %v34_v39 = vld [vmem:[%s2583_s2 + $0x20] sm:$0xff]  ;;  %v49_v42 = vld [vmem:[%s2583_s2 + $0x98] sm:$0xff]  ;;  %v48_v43 = vld [vmem:[%s2583_s2 + $0x90] sm:$0xff] }
  0x10   :  { %v1722_v41 = vld [vmem:[%s2582_s1 + $0x60] sm:$0xff]   ;;  %v33_v44 = vld [vmem:[%s2583_s2 + $0x18] sm:$0xff]  ;;  %v32_v45 = vld [vmem:[%s2583_s2 + $0x10] sm:$0xff] }
  0x11   :  { %228 = vperm.xlu1 %1709, %v43_v14   ;;  %223 = vperm.xlu0 %1708, %v42_v15   ;;  %v1723_v46 = vld [vmem:[%s2582_s1 + $0x68] sm:$0xff]   ;;  %v1724_v47 = vld [vmem:[%s2582_s1 + $0x70] sm:$0xff]   ;;  %v46_v49 = vld [vmem:[%s2583_s2 + $0x80] sm:$0xff] }
  0x12   :  { %1662 = vmatmul.mubr.msk.bf16.gmra.mxu0 %vm401_vm1, %v1713_v16  ;;  %v47_v48 = vld [vmem:[%s2583_s2 + $0x88] sm:$0xff] }
  0x13   :  { %1665 = vmatprep.mubr.msk.bf16.mxu0 %vm401_vm1, %v1714_v17 }
  0x15   :  { %298 = vperm.xlu1 %1709, %v57_v18   ;;  %293 = vperm.xlu0 %1708, %v56_v19  }
  0x19   :  { %218 = vperm.xlu1 %1709, %v41_v20   ;;  %213 = vperm.xlu0 %1708, %v40_v21  }
  0x1a   :  { %1666 = vmatmul.mubr.msk.bf16.gmra.mxu0 %vm401_vm1, %v1715_v22 }
  0x1b   :  { %1669 = vmatprep.mubr.msk.bf16.mxu0 %vm401_vm1, %v1716_v23 }
  0x1d   :  { %288 = vperm.xlu1 %1709, %v55_v24   ;;  %283 = vperm.xlu0 %1708, %v54_v25  }
  0x21   :  { %208 = vperm.xlu1 %1709, %v39_v26   ;;  %203 = vperm.xlu0 %1708, %v38_v27  }
  0x22   :  { %1670 = vmatmul.mubr.msk.bf16.gmra.mxu0 %vm401_vm1, %v1717_v28 }
  0x23   :  { %1673 = vmatprep.mubr.msk.bf16.mxu0 %vm401_vm1, %v1718_v29 }
  0x25   :  { %278 = vperm.xlu1 %1709, %v53_v30   ;;  %273 = vperm.xlu0 %1708, %v52_v31  }
  0x29   :  { %198 = vperm.xlu1 %1709, %v37_v32   ;;  %193 = vperm.xlu0 %1708, %v36_v33  }
  0x2a   :  { %1674 = vmatmul.mubr.msk.bf16.gmra.mxu0 %vm401_vm1, %v1719_v34 }
  0x2b   :  { %1677 = vmatprep.mubr.msk.bf16.mxu0 %vm401_vm1, %v1720_v35 }
  0x2d   :  { %268 = vperm.xlu1 %1709, %v51_v36   ;;  %263 = vperm.xlu0 %1708, %v50_v37  }
  0x31   :  { %188 = vperm.xlu1 %1709, %v35_v38   ;;  %183 = vperm.xlu0 %1708, %v34_v39  }
  0x32   :  { %1678 = vmatmul.mubr.msk.bf16.gmra.mxu0 %vm401_vm1, %v1721_v40 }
  0x33   :  { %1681 = vmatprep.mubr.msk.bf16.mxu0 %vm401_vm1, %v1722_v41 }
  0x35   :  { %258 = vperm.xlu1 %1709, %v49_v42   ;;  %253 = vperm.xlu0 %1708, %v48_v43  }
  0x39   :  { %178 = vperm.xlu1 %1709, %v33_v44   ;;  %173 = vperm.xlu0 %1708, %v32_v45  }
  0x3a   :  { %1682 = vmatmul.mubr.msk.bf16.gmra.mxu0 %vm401_vm1, %v1723_v46 }
  0x3b   :  { %1685 = vmatprep.mubr.msk.bf16.mxu0 %vm401_vm1, %v1724_v47 }
  0x3d   :  { %248 = vperm.xlu1 %1709, %v47_v48   ;;  %243 = vperm.xlu0 %1708, %v46_v49  }
  0x3e   :  { %14 = vsyncpa [#allocation4], 0  ;;  %v31_v50 = vld [vmem:[%s2583_s2 + $0x8] sm:$0xff]  ;;  %v30_v51 = vld [vmem:[%s2583_s2] sm:$0xff] }
  0x3f   :  { %v1725_v52 = vld [vmem:[%s2582_s1 + $0x78] sm:$0xff]   ;;  %v63_v53 = vld [vmem:[%s2585_s4 + $0x8] sm:$0xff]  ;;  %v62_v54 = vld [vmem:[%s2585_s4] sm:$0xff] }
  0x40   :  { %v65_v55 = vld [vmem:[%s2585_s4 + $0x18] sm:$0xff]  ;;  %v64_v56 = vld [vmem:[%s2585_s4 + $0x10] sm:$0xff]  ;;  %v67_v57 = vld [vmem:[%s2585_s4 + $0x28] sm:$0xff] }
  0x41   :  { %168 = vperm.xlu1 %1709, %v31_v50   ;;  %163 = vperm.xlu0 %1708, %v30_v51   ;;  %v66_v58 = vld [vmem:[%s2585_s4 + $0x20] sm:$0xff]  ;;  %v69_v59 = vld [vmem:[%s2585_s4 + $0x38] sm:$0xff]  ;;  %v68_v60 = vld [vmem:[%s2585_s4 + $0x30] sm:$0xff] }
  0x42   :  { %1686 = vmatmul.mubr.msk.bf16.gmra.mxu0 %vm401_vm1, %v1725_v52  ;;  %v71_v61 = vld [vmem:[%s2585_s4 + $0x48] sm:$0xff]  ;;  %v70_v62 = vld [vmem:[%s2585_s4 + $0x40] sm:$0xff]  ;;  %v73_v63 = vld [vmem:[%s2585_s4 + $0x58] sm:$0xff] }
  0x43   :  { %v72_v0 = vld [vmem:[%s2585_s4 + $0x50] sm:$0xff]  ;;  %v75_v1 = vld [vmem:[%s2585_s4 + $0x68] sm:$0xff]  ;;  %v74_v2 = vld [vmem:[%s2585_s4 + $0x60] sm:$0xff] }
  0x44   :  { %v77_v3 = vld [vmem:[%s2585_s4 + $0x78] sm:$0xff]  ;;  %v76_v4 = vld [vmem:[%s2585_s4 + $0x70] sm:$0xff]  ;;  %v79_v5 = vld [vmem:[%s2585_s4 + $0x88] sm:$0xff] }
  0x45   :  { %702 = vperm.xlu1 %1709, %v63_v53   ;;  %697 = vperm.xlu0 %1708, %v62_v54   ;;  %v78_v6 = vld [vmem:[%s2585_s4 + $0x80] sm:$0xff]  ;;  %v81_v7 = vld [vmem:[%s2585_s4 + $0x98] sm:$0xff]  ;;  %v80_v8 = vld [vmem:[%s2585_s4 + $0x90] sm:$0xff] }
  0x46   :  { %v83_v9 = vld [vmem:[%s2585_s4 + $0xa8] sm:$0xff]  ;;  %v82_v10 = vld [vmem:[%s2585_s4 + $0xa0] sm:$0xff]  ;;  %v85_v11 = vld [vmem:[%s2585_s4 + $0xb8] sm:$0xff] }
  0x47   :  { %v84_v12 = vld [vmem:[%s2585_s4 + $0xb0] sm:$0xff]  ;;  %v87_v13 = vld [vmem:[%s2585_s4 + $0xc8] sm:$0xff]  ;;  %v86_v14 = vld [vmem:[%s2585_s4 + $0xc0] sm:$0xff] }
  0x48   :  { %v89_v15 = vld [vmem:[%s2585_s4 + $0xd8] sm:$0xff]  ;;  %v88_v16 = vld [vmem:[%s2585_s4 + $0xd0] sm:$0xff]  ;;  %v91_v17 = vld [vmem:[%s2585_s4 + $0xe8] sm:$0xff] }
  0x49   :  { %712 = vperm.xlu1 %1709, %v65_v55   ;;  %707 = vperm.xlu0 %1708, %v64_v56   ;;  %v90_v18 = vld [vmem:[%s2585_s4 + $0xe0] sm:$0xff]  ;;  %v95_v19 = vld [vmem:[%s2586_s5 + $0x8] sm:$0xff]  ;;  %v97_v23 = vld [vmem:[%s2586_s5 + $0x18] sm:$0xff] }
  0x4a   :  { %v94_v20 = vld [vmem:[%s2586_s5] sm:$0xff]  ;;  %v96_v24 = vld [vmem:[%s2586_s5 + $0x10] sm:$0xff]  ;;  %v99_v27 = vld [vmem:[%s2586_s5 + $0x28] sm:$0xff] }
  0x4b   :  { %v98_v28 = vld [vmem:[%s2586_s5 + $0x20] sm:$0xff]  ;;  %v101_v31 = vld [vmem:[%s2586_s5 + $0x38] sm:$0xff]  ;;  %v100_v32 = vld [vmem:[%s2586_s5 + $0x30] sm:$0xff] }
  0x4c   :  { %v103_v35 = vld [vmem:[%s2586_s5 + $0x48] sm:$0xff]  ;;  %v102_v36 = vld [vmem:[%s2586_s5 + $0x40] sm:$0xff]  ;;  %v105_v39 = vld [vmem:[%s2586_s5 + $0x58] sm:$0xff] }
  0x4d   :  { %722 = vperm.xlu1 %1709, %v67_v57   ;;  %717 = vperm.xlu0 %1708, %v66_v58   ;;  %v104_v40 = vld [vmem:[%s2586_s5 + $0x50] sm:$0xff]  ;;  %v107_v43 = vld [vmem:[%s2586_s5 + $0x68] sm:$0xff]  ;;  %v106_v44 = vld [vmem:[%s2586_s5 + $0x60] sm:$0xff] }
  0x4e   :  { %v109_v47 = vld [vmem:[%s2586_s5 + $0x78] sm:$0xff]  ;;  %v108_v48 = vld [vmem:[%s2586_s5 + $0x70] sm:$0xff]  ;;  %v111_v50 = vld [vmem:[%s2586_s5 + $0x88] sm:$0xff] }
  0x4f   :  { %v110_v51 = vld [vmem:[%s2586_s5 + $0x80] sm:$0xff]  ;;  %v113_v53 = vld [vmem:[%s2586_s5 + $0x98] sm:$0xff]  ;;  %v112_v54 = vld [vmem:[%s2586_s5 + $0x90] sm:$0xff] }
  0x50   :  { %v115_v57 = vld [vmem:[%s2586_s5 + $0xa8] sm:$0xff]  ;;  %v114_v58 = vld [vmem:[%s2586_s5 + $0xa0] sm:$0xff] }
  0x51   :  { %732 = vperm.xlu1 %1709, %v69_v59   ;;  %727 = vperm.xlu0 %1708, %v68_v60   ;;  %v117_v60 = vld [vmem:[%s2586_s5 + $0xb8] sm:$0xff] }
  0x55   :  { %742 = vperm.xlu1 %1709, %v71_v61   ;;  %737 = vperm.xlu0 %1708, %v70_v62   ;;  %v116_v61 = vld [vmem:[%s2586_s5 + $0xb0] sm:$0xff]  ;;  %v1728_v62 = vld [vmem:[%s2584_s3 + $0x4] ss:$8 sps:$4 sm:$0xff]  }
  0x56   :  { %1047 = vmatprep.mubr.bf16.mxu0 %v1728_v62 }
  0x59   :  { %752 = vperm.xlu1 %1709, %v73_v63   ;;  %747 = vperm.xlu0 %1708, %v72_v0   ;;  %v1731_v63 = vld [vmem:[%s2584_s3 + $0x54] ss:$8 sps:$4 sm:$0xff]  }
  0x5a   :  { %1087 = vmatprep.mubr.bf16.mxu1 %v1731_v63 }
  0x5d   :  { %762 = vperm.xlu1 %1709, %v75_v1   ;;  %757 = vperm.xlu0 %1708, %v74_v2   ;;  %v119_v1 = vld [vmem:[%s2586_s5 + $0xc8] sm:$0xff]  ;;  %v118_v2 = vld [vmem:[%s2586_s5 + $0xc0] sm:$0xff] }
  0x61   :  { %772 = vperm.xlu1 %1709, %v77_v3   ;;  %767 = vperm.xlu0 %1708, %v76_v4  }
  0x65   :  { %782 = vperm.xlu1 %1709, %v79_v5   ;;  %777 = vperm.xlu0 %1708, %v78_v6   ;;  %v121_v5 = vld [vmem:[%s2586_s5 + $0xd8] sm:$0xff]  ;;  %v120_v6 = vld [vmem:[%s2586_s5 + $0xd0] sm:$0xff] }
  0x69   :  { %792 = vperm.xlu1 %1709, %v81_v7   ;;  %787 = vperm.xlu0 %1708, %v80_v8   ;;  %v122_v8 = vld [vmem:[%s2586_s5 + $0xe0] sm:$0xff] }
  0x6d   :  { %802 = vperm.xlu1 %1709, %v83_v9   ;;  %797 = vperm.xlu0 %1708, %v82_v10   ;;  %v92_v9 = vld [vmem:[%s2585_s4 + $0xf0] sm:$0xff] }
  0x71   :  { %812 = vperm.xlu1 %1709, %v85_v11   ;;  %807 = vperm.xlu0 %1708, %v84_v12   ;;  %v123_v11 = vld [vmem:[%s2586_s5 + $0xe8] sm:$0xff]  ;;  %v93_v12 = vld [vmem:[%s2585_s4 + $0xf8] sm:$0xff] }
  0x75   :  { %822 = vperm.xlu1 %1709, %v87_v13   ;;  %817 = vperm.xlu0 %1708, %v86_v14  }
  0x79   :  { %832 = vperm.xlu1 %1709, %v89_v15   ;;  %827 = vperm.xlu0 %1708, %v88_v16   ;;  %v125_v15 = vld [vmem:[%s2586_s5 + $0xf8] sm:$0xff]  ;;  %v124_v16 = vld [vmem:[%s2586_s5 + $0xf0] sm:$0xff] }
  0x7d   :  { %842 = vperm.xlu1 %1709, %v91_v17   ;;  %837 = vperm.xlu0 %1708, %v90_v18   ;;  %v126_v18 = vld [vmem:[#allocation2] sm:$0x1] }
  0x80   :  { %v2100_v21 = vpop.permute.xlu0 %313  ;;  %v2102_v22 = vpop.permute.xlu1 %233 }
  0x81   :  { %1215 = vperm.xlu1 %1709, %v95_v19   ;;  %1210 = vperm.xlu0 %1708, %v94_v20  }
  0x84   :  { %v2110_v25 = vpop.permute.xlu0 %318  ;;  %v2112_v26 = vpop.permute.xlu1 %238 }
  0x85   :  { %1225 = vperm.xlu1 %1709, %v97_v23   ;;  %1220 = vperm.xlu0 %1708, %v96_v24  }
  0x88   :  { %v2120_v29 = vpop.permute.xlu0 %303  ;;  %v2122_v30 = vpop.permute.xlu1 %308 }
  0x89   :  { %1235 = vperm.xlu1 %1709, %v99_v27   ;;  %1230 = vperm.xlu0 %1708, %v98_v28  }
  0x8c   :  { %v2130_v33 = vpop.permute.xlu1 %228  ;;  %v2132_v34 = vpop.permute.xlu0 %223 }
  0x8d   :  { %1245 = vperm.xlu1 %1709, %v101_v31   ;;  %1240 = vperm.xlu0 %1708, %v100_v32  }
  0x90   :  { %v2140_v37 = vpop.permute.xlu1 %298  ;;  %v2142_v38 = vpop.permute.xlu0 %293 }
  0x91   :  { %1255 = vperm.xlu1 %1709, %v103_v35   ;;  %1250 = vperm.xlu0 %1708, %v102_v36  }
  0x94   :  { %v2150_v41 = vpop.permute.xlu1 %218  ;;  %v2152_v42 = vpop.permute.xlu0 %213 }
  0x95   :  { %1265 = vperm.xlu1 %1709, %v105_v39   ;;  %1260 = vperm.xlu0 %1708, %v104_v40  }
  0x98   :  { %v2160_v45 = vpop.permute.xlu0 %283  ;;  %v2162_v46 = vpop.permute.xlu1 %288 }
  0x99   :  { %1275 = vperm.xlu1 %1709, %v107_v43   ;;  %1270 = vperm.xlu0 %1708, %v106_v44  }
  0x9c   :  { %v2170_v49 = vpop.permute.xlu0 %203  ;;  %v2178_v52 = vpop.permute.xlu1 %208 }
  0x9d   :  { %1285 = vperm.xlu1 %1709, %v109_v47   ;;  %1280 = vperm.xlu0 %1708, %v108_v48  }
  0xa0   :  { %v2186_v55 = vpop.permute.xlu0 %273  ;;  %v2188_v56 = vpop.permute.xlu1 %278 }
  0xa1   :  { %1295 = vperm.xlu1 %1709, %v111_v50   ;;  %1290 = vperm.xlu0 %1708, %v110_v51  }
  0xa4   :  { %v194_v59 = vpop.permute.xlu0 %193  ;;  %v199_v0 = vpop.permute.xlu1 %198 }
  0xa5   :  { %1305 = vperm.xlu1 %1709, %v113_v53   ;;  %1300 = vperm.xlu0 %1708, %v112_v54  }
  0xa8   :  { %v2214_v3 = vpop.permute.xlu0 %263  ;;  %v2216_v4 = vpop.permute.xlu1 %268 }
  0xa9   :  { %1315 = vperm.xlu1 %1709, %v115_v57   ;;  %1310 = vperm.xlu0 %1708, %v114_v58  }
  0xac   :  { %v184_v7 = vpop.permute.xlu0 %183  ;;  %v189_v10 = vpop.permute.xlu1 %188 }
  0xad   :  { %1325 = vperm.xlu1 %1709, %v117_v60   ;;  %1320 = vperm.xlu0 %1708, %v116_v61  }
  0xb0   :  { %v2236_v13 = vpop.permute.xlu0 %253  ;;  %v2238_v14 = vpop.permute.xlu1 %258 }
  0xb1   :  { %1335 = vperm.xlu1 %1709, %v119_v1   ;;  %1330 = vperm.xlu0 %1708, %v118_v2  }
  0xb4   :  { %v174_v17 = vpop.permute.xlu0 %173  ;;  %v179_v19 = vpop.permute.xlu1 %178 }
  0xb5   :  { %1345 = vperm.xlu1 %1709, %v121_v5   ;;  %1340 = vperm.xlu0 %1708, %v120_v6  }
  0xb8   :  { %v2246_v20 = vpop.permute.xlu0 %243  ;;  %v2248_v23 = vpop.permute.xlu1 %248 }
  0xb9   :  { %1350 = vperm.xlu1 %1709, %v122_v8   ;;  %847 = vperm.xlu0 %1708, %v92_v9  }
  0xbc   :  { %v164_v31 = vpop.permute.xlu0 %163  ;;  %v169_v39 = vpop.permute.xlu1 %168 }
  0xbd   :  { %1355 = vperm.xlu1 %1709, %v123_v11   ;;  %852 = vperm.xlu0 %1708, %v93_v12  }
  0xc1   :  { %1365 = vperm.xlu1 %1709, %v125_v15   ;;  %1360 = vperm.xlu0 %1708, %v124_v16  }
  0xc5   :  { %1439 = vperm.xlu0 %1708, %v126_v18  }
  0xca   :  { %v1659_v24 = vpop.f32.mrf.mxu0 }
  0xcb   :  { %v497_v28 = vadd.f32 %v1659_v24, %v174_v17 }
  0xcc   :  { %v488_v27 = vpop.f32.mrf.mxu0 }
  0xcd   :  { %v489_v35 = vadd.f32 %v488_v27, %v164_v31  ;;  %v617_v43 = vmax.f32 %v497_v28, 0.0 }
  0xce   :  { %v1660_v32 = vpop.f32.mrf.mxu0 }
  0xcf   :  { %v500_v36 = vadd.f32 %v1660_v32, %v179_v19  ;;  %v615_v50 = vmax.f32 %v489_v35, 0.0 }
  0xd0   :  { %v491_v40 = vpop.f32.mrf.mxu0 }
  0xd1   :  { %v618_v44 = vmax.f32 %v500_v36, 0.0  ;;  %v492_v47 = vadd.f32 %v491_v40, %v169_v39 }
  0xd2   :  { %v1663_v48 = vpop.f32.mrf.mxu0 }
  0xd3   :  { %v2250_v51 = vpack.c.bf16 %v618_v44, %v617_v43  ;;  %v616_v53 = vmax.f32 %v492_v47, 0.0  ;;  %v513_v58 = vadd.f32 %v1663_v48, %v194_v59 }
  0xd4   :  { %v504_v54 = vpop.f32.mrf.mxu0 }
  0xd5   :  { %v2252_v57 = vpack.c.bf16 %v616_v53, %v615_v50  ;;  %v505_v61 = vadd.f32 %v504_v54, %v184_v7  ;;  %v621_v1 = vmax.f32 %v513_v58, 0.0 }
  0xd6   :  { %v1664_v60 = vpop.f32.mrf.mxu0 }
  0xd7   :  { %v516_v62 = vadd.f32 %v1664_v60, %v199_v0  ;;  %v619_v8 = vmax.f32 %v505_v61, 0.0 }
  0xd8   :  { %v507_v63 = vpop.f32.mrf.mxu0 }
  0xd9   :  { %v622_v2 = vmax.f32 %v516_v62, 0.0  ;;  %v508_v5 = vadd.f32 %v507_v63, %v189_v10 }
  0xda   :  { %v1667_v6 = vpop.f32.mrf.mxu0 }
  0xdb   :  { %v2254_v9 = vpack.c.bf16 %v622_v2, %v621_v1  ;;  %v620_v11 = vmax.f32 %v508_v5, 0.0 }
  0xdc   :  { %v2256_v12 = vpop.f32.mrf.mxu0 }
  0xdd   :  { %v2258_v15 = vpack.c.bf16 %v620_v11, %v619_v8 }
  0xde   :  { %v1668_v16 = vpop.f32.mrf.mxu0 }
  0xe0   :  { %v523_v17 = vpop.f32.mrf.mxu0 }
  0xe2   :  { %v1671_v18 = vpop.f32.mrf.mxu0 }
  0xe3   :  { %v545_v53 = vadd.f32 %v1671_v18, %v2102_v22 }
  0xe4   :  { %v536_v59 = vpop.f32.mrf.mxu0 }
  0xe5   :  { %v629_v8 = vmax.f32 %v545_v53, 0.0 }
  0xe6   :  { %v1672_v19 = vpop.f32.mrf.mxu0 }
  0xe7   :  { %v548_v47 = vadd.f32 %v1672_v19, %v2112_v26 }
  0xe8   :  { %v539_v7 = vpop.f32.mrf.mxu0 }
  0xe9   :  { %v630_v61 = vmax.f32 %v548_v47, 0.0  ;;  %v540_v62 = vadd.f32 %v539_v7, %v2130_v33 }
  0xea   :  { %v2260_v0 = vpop.f32.mrf.mxu0 }
  0xeb   :  { %v686_v19 = vpack.c.bf16 %v630_v61, %v629_v8  ;;  %v1742_v61 = vld [vmem:[%s2584_s3 + $0x20] ss:$8 sps:$4 sm:$0xff]   ;;  %v1752_v8 = vld [vmem:[%s2584_s3 + $0x94] ss:$8 sps:$4 sm:$0xff]  }
  0xec   :  { %v2262_v24 = vpop.f32.mrf.mxu0 }
  0xee   :  { %v2264_v10 = vpop.f32.mrf.mxu0 }
  0xf0   :  { %v2266_v27 = vpop.f32.mrf.mxu0 }
  0xf2   :  { %v1679_v28 = vpop.f32.mrf.mxu0 }
  0xf4   :  { %v2268_v31 = vpop.f32.mrf.mxu0 }
  0xf6   :  { %v1680_v32 = vpop.f32.mrf.mxu0 }
  0xf8   :  { %v571_v35 = vpop.f32.mrf.mxu0 }
  0xfa   :  { %v1683_v36 = vpop.f32.mrf.mxu0 }
  0xfb   :  { %v593_v22 = vadd.f32 %v1683_v36, %v2142_v38  ;;  %v580_v36 = vadd.f32 %v1680_v32, %v2188_v56 }
  0xfc   :  { %v584_v39 = vpop.f32.mrf.mxu0 }
  0xfd   :  { %v585_v38 = vadd.f32 %v584_v39, %v2160_v45 }
  0xfe   :  { %v1684_v40 = vpop.f32.mrf.mxu0 }
  0xff   :  { %v596_v1 = vadd.f32 %v1684_v40, %v2140_v37 }
 0x100   :  { %v587_v43 = vpop.f32.mrf.mxu0 }
 0x101   :  { %v642_v33 = vmax.f32 %v596_v1, 0.0  ;;  %v588_v7 = vadd.f32 %v587_v43, %v2162_v46  ;;  %v1746_v1 = vld [vmem:[%s2584_s3 + $0x84] ss:$8 sps:$4 sm:$0xff]  }
 0x102   :  { %v1687_v44 = vpop.f32.mrf.mxu0 }
 0x103   :  { %v609_v50 = vadd.f32 %v1687_v44, %v2100_v21  ;;  %v537_v21 = vadd.f32 %v536_v59, %v2132_v34  ;;  %v628_v44 = vmax.f32 %v540_v62, 0.0  ;;  %v641_v34 = vmax.f32 %v593_v22, 0.0  ;;  %v1743_v62 = vld [vmem:[%s2584_s3 + $0x70] ss:$8 sps:$4 sm:$0xff]  }
 0x104   :  { %v600_v48 = vpop.f32.mrf.mxu0  ;;  %v640_v43 = vmax.f32 %v588_v7, 0.0  ;;  %v1755_v22 = vld [vmem:[%s2584_s3 + $0x90] ss:$8 sps:$4 sm:$0xff]  }
 0x105   :  { %v601_v58 = vadd.f32 %v600_v48, %v2120_v29  ;;  %v645_v2 = vmax.f32 %v609_v50, 0.0  ;;  %v627_v40 = vmax.f32 %v537_v21, 0.0  ;;  %v692_v46 = vpack.c.bf16 %v642_v33, %v641_v34  ;;  %v1754_v21 = vld [vmem:[%s2584_s3 + $0x40] ss:$8 sps:$4 sm:$0xff]   ;;  %v1765_v33 = vld [vmem:[%s2584_s3 + $0xd4] ss:$8 sps:$4 sm:$0xff]  }
 0x106   :  { %v1688_v54 = vpop.f32.mrf.mxu0  ;;  %v639_v48 = vmax.f32 %v585_v38, 0.0  ;;  %v638_v50 = vmax.f32 %v580_v36, 0.0  ;;  %v1767_v7 = vld [vmem:[%s2584_s3 + $0xd0] ss:$8 sps:$4 sm:$0xff]   ;;  %v2398_v38 = vpop.permute.xlu0 %697 }
 0x107   :  { %v612_v60 = vadd.f32 %v1688_v54, %v2110_v25  ;;  %v643_v11 = vmax.f32 %v601_v58, 0.0  ;;  %v532_v25 = vadd.f32 %v1668_v16, %v2150_v41  ;;  %v524_v41 = vadd.f32 %v523_v17, %v2178_v52  ;;  %v1773_v34 = vld [vmem:[%s2584_s3 + $0xf0] ss:$8 sps:$4 sm:$0xff]  }
 0x108   :  { %v603_v63 = vpop.f32.mrf.mxu0  ;;  %v685_v16 = vpack.c.bf16 %v628_v44, %v627_v40  ;;  %v572_v52 = vadd.f32 %v571_v35, %v2216_v4  ;;  %v691_v17 = vpack.c.bf16 %v640_v43, %v639_v48  ;;  %v561_v4 = vadd.f32 %v2260_v0, %v2236_v13  ;;  %v1764_v44 = vld [vmem:[%s2584_s3 + $0xc0] ss:$8 sps:$4 sm:$0xff]   ;;  %v1771_v40 = vld [vmem:[%s2584_s3 + $0xf4] ss:$8 sps:$4 sm:$0xff]  }
 0x109   :  { %v646_v5 = vmax.f32 %v612_v60, 0.0  ;;  %v604_v26 = vadd.f32 %v603_v63, %v2122_v30  ;;  %v529_v30 = vadd.f32 %v1667_v6, %v2152_v42  ;;  %v626_v59 = vmax.f32 %v532_v25, 0.0  ;;  %v1740_v60 = vld [vmem:[%s2584_s3 + $0x74] ss:$8 sps:$4 sm:$0xff]   ;;  %v1761_v25 = vld [vmem:[%s2584_s3 + $0xb0] ss:$8 sps:$4 sm:$0xff]  }
 0x10a   :  { %v521_v42 = vadd.f32 %v2256_v12, %v2170_v49  ;;  %v577_v6 = vadd.f32 %v1679_v28, %v2186_v55  ;;  %v624_v39 = vmax.f32 %v524_v41, 0.0  ;;  %v569_v49 = vadd.f32 %v2268_v31, %v2214_v3  ;;  %v1744_v63 = vld [vmem:[%s2584_s3 + $0x34] ss:$8 sps:$4 sm:$0xff]   ;;  %v2400_v41 = vpop.permute.xlu0 %707 }
 0x10b   :  { %v694_v18 = vpack.c.bf16 %v646_v5, %v645_v2  ;;  %v644_v29 = vmax.f32 %v604_v26, 0.0  ;;  %v625_v47 = vmax.f32 %v529_v30, 0.0  ;;  %v564_v55 = vadd.f32 %v2264_v10, %v2238_v14  ;;  %v1748_v2 = vld [vmem:[%s2584_s3 + $0x30] ss:$8 sps:$4 sm:$0xff]   ;;  %v1749_v5 = vld [vmem:[%s2584_s3 + $0x80] ss:$8 sps:$4 sm:$0xff]  }
 0x10c   :  { %v623_v56 = vmax.f32 %v521_v42, 0.0  ;;  %v637_v32 = vmax.f32 %v577_v6, 0.0  ;;  %v636_v53 = vmax.f32 %v572_v52, 0.0  ;;  %v635_v35 = vmax.f32 %v569_v49, 0.0  ;;  %v1750_v26 = vld [vmem:[%s2584_s3 + $0x44] ss:$8 sps:$4 sm:$0xff]  }
 0x10d   :  { %v693_v37 = vpack.c.bf16 %v644_v29, %v643_v11  ;;  %1543 = vmatprep.subr.bf16.mxu0 %v694_v18  ;;  %1689 = vmatprep.subr.bf16.mxu1 %v694_v18  ;;  %v684_v45 = vpack.c.bf16 %v626_v59, %v625_v47  ;;  %v634_v54 = vmax.f32 %v564_v55, 0.0  ;;  %v556_v3 = vadd.f32 %v2266_v27, %v2248_v23  ;;  %v1738_v27 = vld [vmem:[%s2584_s3 + $0x24] ss:$8 sps:$4 sm:$0xff]   ;;  %v1758_v18 = vld [vmem:[%s2584_s3 + $0xa0] ss:$8 sps:$4 sm:$0xff]   ;;  %v703_v59 = vpop.permute.xlu1 %702 }
 0x10e   :  { %1544 = vmatpush3.bf16.msra.mxu0 %v686_v19  ;;  %1697 = vmatpush3.bf16.msra.mxu1 %v686_v19  ;;  %v683_v12 = vpack.c.bf16 %v624_v39, %v623_v56  ;;  %v690_v28 = vpack.c.bf16 %v638_v50, %v637_v32  ;;  %v689_v31 = vpack.c.bf16 %v636_v53, %v635_v35  ;;  %v633_v14 = vmax.f32 %v561_v4, 0.0  ;;  %v1756_v11 = vld [vmem:[%s2584_s3 + $0xa4] ss:$8 sps:$4 sm:$0xff]   ;;  %v1759_v29 = vld [vmem:[%s2584_s3 + $0xb4] ss:$8 sps:$4 sm:$0xff]   ;;  %v2404_v36 = vpop.permute.xlu0 %717 }
 0x10f   :  { %1545 = vmatprep.subr.bf16.mxu0 %v693_v37  ;;  %1690 = vmatprep.subr.bf16.mxu1 %v693_v37  ;;  %v553_v10 = vadd.f32 %v2262_v24, %v2246_v20  ;;  %v632_v13 = vmax.f32 %v556_v3, 0.0  ;;  %v1726_v20 = vld [vmem:[%s2584_s3] ss:$8 sps:$4 sm:$0xff]   ;;  %v1736_v24 = vld [vmem:[%s2584_s3 + $0x10] ss:$8 sps:$4 sm:$0xff]  }
 0x110   :  { %v688_v58 = vpack.c.bf16 %v634_v54, %v633_v14  ;;  %v1762_v19 = vld [vmem:[%s2584_s3 + $0xc4] ss:$8 sps:$4 sm:$0xff]   ;;  %v1770_v30 = vld [vmem:[%s2584_s3 + $0xe0] ss:$8 sps:$4 sm:$0xff]  }
 0x111   :  { %v631_v0 = vmax.f32 %v553_v10, 0.0  ;;  %v1768_v37 = vld [vmem:[%s2584_s3 + $0xe4] ss:$8 sps:$4 sm:$0xff]  }
 0x112   :  { %1546 = vmatpush3.bf16.msra.mxu0 %v685_v16  ;;  %1698 = vmatpush3.bf16.msra.mxu1 %v685_v16  ;;  %v2402_v16 = vpop.permute.xlu1 %712  ;;  %v2408_v43 = vpop.permute.xlu0 %727 }
 0x113   :  { %1547 = vmatprep.subr.bf16.mxu0 %v692_v46  ;;  %1691 = vmatprep.subr.bf16.mxu1 %v692_v46  ;;  %v687_v23 = vpack.c.bf16 %v632_v13, %v631_v0 }
 0x116   :  { %1548 = vmatpush3.bf16.msra.mxu0 %v684_v45  ;;  %1699 = vmatpush3.bf16.msra.mxu1 %v684_v45  ;;  %v2406_v46 = vpop.permute.xlu1 %722  ;;  %v2412_v42 = vpop.permute.xlu0 %737 }
 0x117   :  { %1549 = vmatprep.subr.bf16.mxu0 %v691_v17  ;;  %1692 = vmatprep.subr.bf16.mxu1 %v691_v17 }
 0x11a   :  { %1550 = vmatpush3.bf16.msra.mxu0 %v683_v12  ;;  %1700 = vmatpush3.bf16.msra.mxu1 %v683_v12  ;;  %v2410_v47 = vpop.permute.xlu1 %732  ;;  %v2416_v48 = vpop.permute.xlu0 %747 }
 0x11b   :  { %1551 = vmatprep.subr.bf16.mxu0 %v690_v28  ;;  %1693 = vmatprep.subr.bf16.mxu1 %v690_v28 }
 0x11e   :  { %1552 = vmatpush3.bf16.msra.mxu0 %v2254_v9  ;;  %1701 = vmatpush3.bf16.msra.mxu1 %v2254_v9  ;;  %v1729_v9 = vld [vmem:[%s2584_s3 + $0x50] ss:$8 sps:$4 sm:$0xff]   ;;  %v2414_v6 = vpop.permute.xlu1 %742  ;;  %v2420_v39 = vpop.permute.xlu0 %757 }
 0x11f   :  { %1553 = vmatprep.subr.bf16.mxu0 %v689_v31  ;;  %1694 = vmatprep.subr.bf16.mxu1 %v689_v31 }
 0x122   :  { %1554 = vmatpush3.bf16.msra.mxu0 %v2258_v15  ;;  %1702 = vmatpush3.bf16.msra.mxu1 %v2258_v15  ;;  %v1732_v15 = vld [vmem:[%s2584_s3 + $0x14] ss:$8 sps:$4 sm:$0xff]   ;;  %v2418_v45 = vpop.permute.xlu1 %752  ;;  %v2424_v52 = vpop.permute.xlu0 %767 }
 0x123   :  { %1555 = vmatprep.subr.bf16.mxu0 %v688_v58  ;;  %1695 = vmatprep.subr.bf16.mxu1 %v688_v58 }
 0x126   :  { %1556 = vmatpush3.bf16.msra.mxu0 %v2250_v51  ;;  %1703 = vmatpush3.bf16.msra.mxu1 %v2250_v51  ;;  %v1734_v51 = vld [vmem:[%s2584_s3 + $0x64] ss:$8 sps:$4 sm:$0xff]   ;;  %v2422_v50 = vpop.permute.xlu1 %762  ;;  %v2428_v56 = vpop.permute.xlu0 %777 }
 0x127   :  { %1557 = vmatprep.subr.bf16.mxu0 %v687_v23  ;;  %1696 = vmatprep.subr.bf16.mxu1 %v687_v23 }
 0x12a   :  { %1558 = vmatpush3.bf16.msra.mxu0 %v2252_v57  ;;  %1704 = vmatpush3.bf16.msra.mxu1 %v2252_v57  ;;  %v1737_v57 = vld [vmem:[%s2584_s3 + $0x60] ss:$8 sps:$4 sm:$0xff]   ;;  %v2426_v17 = vpop.permute.xlu1 %772  ;;  %v2432_v49 = vpop.permute.xlu0 %787  ;;  %s1797_s3 = smov [#allocation3]  }
 0x12b   :  { %s1454_s21 = sshll.u32 %s1797_s3, 4  ;;  %s1455_s21 = int_to_ptr.vmem [resolvable:$true] %s1454_s21 }
 0x12c   :  { %s1774_s22 = scalar_lea.vmem %s1455_s21, 16  ;;  %s1778_s23 = scalar_lea.vmem %s1455_s21, 32 }
 0x12d   :  { %1048 = vmatmul.mubr.bf16.vlgmr.msra.gmra.mxu0 %v1726_v20  ;;  %1088 = vmatmul.mubr.bf16.vlgmr.msra.gmra.mxu1 %v1729_v9  ;;  %p1775_p0 = scmp.ne.s32.totalorder %s1455_s21, %s1774_s22  ;;  %p1779_p1 = scmp.lt.s32.totalorder %s1455_s21, %s1455_s21 }
 0x12e   :  { %1055 = vmatprep.mubr.bf16.mxu0 %v1732_v15  ;;  %1095 = vmatprep.mubr.bf16.mxu1 %v1734_v51  ;;  %v2430_v32 = vpop.permute.xlu1 %782  ;;  %v2436_v55 = vpop.permute.xlu0 %797  ;;  %p1780_p2 = scmp.lt.s32.totalorder %s1778_s23, %s1774_s22 }
 0x12f   :  { %2589 = vst [vmem:[#allocation6_spill] sm:$0xff] %v2436_v55 }
 0x130   :  { %p1781_p3 = por %p1780_p2, %p1779_p1 }
 0x132   :  { %v2434_v12 = vpop.permute.xlu1 %792  ;;  %v2440_v53 = vpop.permute.xlu0 %807  ;;  %p1782_p4 = pnand %p1781_p3, %p1775_p0 }
 0x133   :  { %2591 = vst [vmem:[#allocation8_spill] sm:$0xff] %v2440_v53 }
 0x135   :  { %1056 = vmatmul.mubr.bf16.gmra.mxu0 %v1736_v24  ;;  %1096 = vmatmul.mubr.bf16.gmra.mxu1 %v1737_v57 }
 0x136   :  { %1063 = vmatprep.mubr.bf16.mxu0 %v1738_v27  ;;  %1103 = vmatprep.mubr.bf16.mxu1 %v1740_v60  ;;  %v2438_v28 = vpop.permute.xlu1 %802  ;;  %v2444_v35 = vpop.permute.xlu0 %817 }
 0x137   :  { %2590 = vst [vmem:[#allocation7_spill] sm:$0xff] %v2438_v28  ;;  %2593 = vst [vmem:[#allocation10_spill] sm:$0xff] %v2444_v35 }
 0x13a   :  { %v2442_v4 = vpop.permute.xlu1 %812  ;;  %v2448_v3 = vpop.permute.xlu0 %827 }
 0x13b   :  { %2592 = vst [vmem:[#allocation9_spill] sm:$0xff] %v2442_v4  ;;  %2595 = vst [vmem:[#allocation12_spill] sm:$0xff] %v2448_v3 }
 0x13d   :  { %1064 = vmatmul.mubr.bf16.gmra.mxu0 %v1742_v61  ;;  %1104 = vmatmul.mubr.bf16.gmra.mxu1 %v1743_v62 }
 0x13e   :  { %1071 = vmatprep.mubr.bf16.mxu0 %v1744_v63  ;;  %1111 = vmatprep.mubr.bf16.mxu1 %v1746_v1  ;;  %v2446_v54 = vpop.permute.xlu1 %822  ;;  %v2452_v14 = vpop.permute.xlu0 %837 }
 0x13f   :  { %2594 = vst [vmem:[#allocation11_spill] sm:$0xff] %v2446_v54  ;;  %2597 = vst [vmem:[#allocation14_spill] sm:$0xff] %v2452_v14 }
 0x142   :  { %v2450_v31 = vpop.permute.xlu1 %832  ;;  %v1211_v58 = vpop.permute.xlu0 %1210 }
 0x143   :  { %2596 = vst [vmem:[#allocation13_spill] sm:$0xff] %v2450_v31 }
 0x145   :  { %1072 = vmatmul.mubr.bf16.gmra.mxu0 %v1748_v2  ;;  %1112 = vmatmul.mubr.bf16.gmra.mxu1 %v1749_v5 }
 0x146   :  { %1079 = vmatprep.mubr.bf16.mxu0 %v1750_v26  ;;  %1119 = vmatprep.mubr.bf16.mxu1 %v1752_v8  ;;  %v2454_v10 = vpop.permute.xlu1 %842  ;;  %v1221_v0 = vpop.permute.xlu0 %1220 }
 0x147   :  { %2598 = vst [vmem:[#allocation15_spill] sm:$0xff] %v2454_v10 }
 0x14a   :  { %v1216_v13 = vpop.permute.xlu1 %1215  ;;  %v2462_v24 = vpop.permute.xlu0 %1230 }
 0x14d   :  { %1080 = vmatmul.mubr.bf16.gmra.mxu0 %v1754_v21  ;;  %1120 = vmatmul.mubr.bf16.gmra.mxu1 %v1755_v22 }
 0x14e   :  { %1127 = vmatprep.mubr.bf16.mxu1 %v1756_v11  ;;  %v2458_v9 = vpop.permute.xlu1 %1225  ;;  %v2472_v2 = vpop.permute.xlu0 %1240 }
 0x152   :  { %v2468_v62 = vpop.permute.xlu1 %1235 }
 0x155   :  { %1128 = vmatmul.mubr.bf16.gmra.mxu1 %v1758_v18 }
 0x156   :  { %1135 = vmatprep.mubr.bf16.mxu1 %v1759_v29  ;;  %v2478_v22 = vpop.permute.xlu1 %1245  ;;  %v2482_v29 = vpop.permute.xlu0 %1250 }
 0x15a   :  { %v2492_v3 = vpop.permute.xlu0 %1260 }
 0x15d   :  { %1136 = vmatmul.mubr.bf16.gmra.mxu1 %v1761_v25 }
 0x15e   :  { %1143 = vmatprep.mubr.bf16.mxu1 %v1762_v19 }
 0x165   :  { %1144 = vmatmul.mubr.bf16.gmra.mxu1 %v1764_v44 }
 0x166   :  { %1151 = vmatprep.mubr.bf16.mxu1 %v1765_v33 }
 0x16d   :  { %1152 = vmatmul.mubr.bf16.gmra.mxu1 %v1767_v7 }
 0x16e   :  { %1159 = vmatprep.mubr.bf16.mxu1 %v1768_v37 }
 0x175   :  { %1160 = vmatmul.mubr.bf16.gmra.mxu1 %v1770_v30 }
 0x176   :  { %1167 = vmatprep.mubr.bf16.mxu1 %v1771_v40  ;;  %v2488_v40 = vpop.permute.xlu1 %1255 }
 0x17d   :  { %1168 = vmatmul.mubr.bf16.gmra.mxu1 %v1773_v34 }
 0x1ed   :  { %v1559_v23 = vpop.f32.mrf.mxu0  ;;  %v2456_v20 = vpop.f32.mrf.mxu1 }
 0x1ef   :  { %v1560_v15 = vpop.f32.mrf.mxu0  ;;  %v2460_v51 = vpop.f32.mrf.mxu1 }
 0x1f0   :  { %v1561_v33 = vadd.f32 %v1560_v15, %v1559_v23 }
 0x1f1   :  { %v1562_v57 = vpop.f32.mrf.mxu0  ;;  %v2464_v27 = vpop.f32.mrf.mxu1 }
 0x1f2   :  { %v1050_v54 = vadd.f32 %v1561_v33, %v2398_v38 }
 0x1f3   :  { %v1563_v60 = vpop.f32.mrf.mxu0  ;;  %v2466_v61 = vpop.f32.mrf.mxu1 }
 0x1f4   :  { %v1564_v25 = vadd.f32 %v1563_v60, %v1562_v57 }
 0x1f5   :  { %v1565_v63 = vpop.f32.mrf.mxu0  ;;  %v2470_v1 = vpop.f32.mrf.mxu1 }
 0x1f6   :  { %v1053_v34 = vadd.f32 %v1564_v25, %v703_v59 }
 0x1f7   :  { %v1566_v5 = vpop.f32.mrf.mxu0  ;;  %v2474_v26 = vpop.f32.mrf.mxu1 }
 0x1f8   :  { %v1567_v7 = vadd.f32 %v1566_v5, %v1565_v63  ;;  %v1177_v15 = vmax.f32 %v1053_v34, 0.0 }
 0x1f9   :  { %v1568_v8 = vpop.f32.mrf.mxu0  ;;  %v2476_v21 = vpop.f32.mrf.mxu1 }
 0x1fa   :  { %v1058_v57 = vadd.f32 %v1567_v7, %v2400_v41  ;;  %v2506_v41 = vpop.permute.xlu0 %1270 }
 0x1fb   :  { %v1569_v11 = vpop.f32.mrf.mxu0  ;;  %v2480_v18 = vpop.f32.mrf.mxu1 }
 0x1fc   :  { %v1570_v10 = vadd.f32 %v1569_v11, %v1568_v8  ;;  %v2501_v8 = vpop.permute.xlu1 %1265  ;;  %v1176_v11 = vmax.f32 %v1050_v54, 0.0  ;;  %v1178_v25 = vmax.f32 %v1058_v57, 0.0 }
 0x1fd   :  { %v1571_v19 = vpop.f32.mrf.mxu0  ;;  %v2484_v44 = vpop.f32.mrf.mxu1 }
 0x1fe   :  { %v1061_v63 = vadd.f32 %v1570_v10, %v2402_v16  ;;  %v1368_v10 = vmul.f32 %v1211_v58, %v1176_v11  ;;  %v1370_v34 = vmul.f32 %v1221_v0, %v1178_v25  ;;  %v1591_v11 = vadd.f32 %v2460_v51, %v2456_v20 }
 0x1ff   :  { %v1572_v37 = vpop.f32.mrf.mxu0  ;;  %v2486_v30 = vpop.f32.mrf.mxu1  ;;  %v1597_v51 = vadd.f32 %v2474_v26, %v2470_v1 }
 0x200   :  { %v1573_v60 = vadd.f32 %v1572_v37, %v1571_v19  ;;  %v1369_v19 = vmul.f32 %v1216_v13, %v1177_v15  ;;  %v1179_v7 = vmax.f32 %v1061_v63, 0.0  ;;  %v1090_v20 = vadd.f32 %v1591_v11, %v2416_v48 }
 0x201   :  { %v1574_v14 = vpop.f32.mrf.mxu0  ;;  %v2490_v31 = vpop.f32.mrf.mxu1  ;;  %v1603_v26 = vadd.f32 %v2486_v30, %v2484_v44 }
 0x202   :  { %v1066_v53 = vadd.f32 %v1573_v60, %v2404_v36  ;;  %v2514_v60 = vpop.permute.xlu1 %1275  ;;  %v1400_v55 = vadd.f32 %v1369_v19, %v1368_v10  ;;  %v1371_v13 = vmul.f32 %v2458_v9, %v1179_v7 }
 0x203   :  { %v1575_v35 = vpop.f32.mrf.mxu0  ;;  %v2496_v23 = vpop.f32.mrf.mxu1  ;;  %v1106_v44 = vadd.f32 %v1603_v26, %v2424_v52  ;;  %v2599_v26 = vld [vmem:[#allocation6_spill] sm:$0xff] }
 0x204   :  { %v1576_v5 = vadd.f32 %v1575_v35, %v1574_v14  ;;  %v1180_v28 = vmax.f32 %v1066_v53, 0.0  ;;  %v1401_v58 = vadd.f32 %v1400_v55, %v1370_v34 }
 0x205   :  { %v1577_v4 = vpop.f32.mrf.mxu0  ;;  %v2499_v59 = vpop.f32.mrf.mxu1  ;;  %v1190_v52 = vmax.f32 %v1106_v44, 0.0 }
 0x206   :  { %v1069_v37 = vadd.f32 %v1576_v5, %v2406_v46  ;;  %v2519_v5 = vpop.permute.xlu0 %1280  ;;  %v1372_v53 = vmul.f32 %v2462_v24, %v1180_v28  ;;  %v1402_v19 = vadd.f32 %v1401_v58, %v1371_v13  ;;  %v2528_v10 = vpop.permute.xlu1 %1285  ;;  %v1098_v58 = vadd.f32 %v1597_v51, %v2420_v39 }
 0x207   :  { %v1578_v38 = vpop.f32.mrf.mxu0  ;;  %v2504_v33 = vpop.f32.mrf.mxu1 }
 0x208   :  { %v1579_v16 = vadd.f32 %v1578_v38, %v1577_v4  ;;  %v1181_v15 = vmax.f32 %v1069_v37, 0.0  ;;  %v1403_v28 = vadd.f32 %v1402_v19, %v1372_v53  ;;  %v1188_v39 = vmax.f32 %v1098_v58, 0.0 }
 0x209   :  { %v1580_v35 = vpop.f32.mrf.mxu0  ;;  %v2509_v14 = vpop.f32.mrf.mxu1 }
 0x20a   :  { %v1074_v54 = vadd.f32 %v1579_v16, %v2408_v43  ;;  %v1373_v9 = vmul.f32 %v2468_v62, %v1181_v15  ;;  %v1594_v16 = vadd.f32 %v2466_v61, %v2464_v27  ;;  %v2536_v13 = vpop.permute.xlu0 %1290 }
 0x20b   :  { %v1581_v57 = vpop.f32.mrf.mxu0  ;;  %v2512_v36 = vpop.f32.mrf.mxu1 }
 0x20c   :  { %v1582_v63 = vadd.f32 %v1581_v57, %v1580_v35  ;;  %v1182_v0 = vmax.f32 %v1074_v54, 0.0  ;;  %v1404_v54 = vadd.f32 %v1403_v28, %v1373_v9  ;;  %v1093_v15 = vadd.f32 %v1594_v16, %v2418_v45 }
 0x20d   :  { %v1583_v46 = vpop.f32.mrf.mxu0  ;;  %v2517_v4 = vpop.f32.mrf.mxu1  ;;  %v1609_v9 = vadd.f32 %v2504_v33, %v2499_v59 }
 0x20e   :  { %v1077_v43 = vadd.f32 %v1582_v63, %v2410_v47  ;;  %v1374_v47 = vmul.f32 %v2472_v2, %v1182_v0  ;;  %v1187_v45 = vmax.f32 %v1093_v15, 0.0 }
 0x20f   :  { %v1584_v25 = vpop.f32.mrf.mxu0  ;;  %v1614_v38 = vpop.f32.mrf.mxu1 }
 0x210   :  { %v1183_v7 = vmax.f32 %v1077_v43, 0.0  ;;  %v1585_v37 = vadd.f32 %v1584_v25, %v1583_v46  ;;  %v1405_v2 = vadd.f32 %v1404_v54, %v1374_v47  ;;  %v1296_v43 = vpop.permute.xlu1 %1295  ;;  %v1114_v47 = vadd.f32 %v1609_v9, %v2428_v56 }
 0x211   :  { %v1586_v35 = vpop.f32.mrf.mxu0  ;;  %v1616_v55 = vpop.f32.mrf.mxu1  ;;  %v1615_v59 = vadd.f32 %v1614_v38, %v2517_v4 }
 0x212   :  { %v1082_v24 = vadd.f32 %v1585_v37, %v2412_v42  ;;  %v1375_v57 = vmul.f32 %v2478_v22, %v1183_v7  ;;  %v1600_v42 = vadd.f32 %v2480_v18, %v2476_v21  ;;  %v1186_v22 = vmax.f32 %v1090_v20, 0.0 }
 0x213   :  { %v1587_v62 = vpop.f32.mrf.mxu0  ;;  %v1617_v34 = vpop.f32.mrf.mxu1  ;;  %v1606_v21 = vadd.f32 %v2496_v23, %v2490_v31  ;;  %v1379_v37 = vmul.f32 %v2501_v8, %v1187_v45  ;;  %v2601_v45 = vld [vmem:[#allocation8_spill] sm:$0xff] }
 0x214   :  { %v1184_v27 = vmax.f32 %v1082_v24, 0.0  ;;  %v1588_v61 = vadd.f32 %v1587_v62, %v1586_v35  ;;  %v1406_v53 = vadd.f32 %v1405_v2, %v1375_v57  ;;  %v1101_v25 = vadd.f32 %v1600_v42, %v2422_v50  ;;  %v1306_v35 = vpop.permute.xlu1 %1305 }
 0x215   :  { %v1619_v63 = vpop.f32.mrf.mxu1  ;;  %v1378_v19 = vmul.f32 %v2492_v3, %v1186_v22  ;;  %v1109_v31 = vadd.f32 %v1606_v21, %v2426_v17  ;;  %v1380_v3 = vmul.f32 %v2506_v41, %v1188_v39  ;;  %v1618_v8 = vadd.f32 %v1617_v34, %v1616_v55 }
 0x216   :  { %v1376_v48 = vmul.f32 %v2482_v29, %v1184_v27  ;;  %v1085_v1 = vadd.f32 %v1588_v61, %v2414_v6  ;;  %v1301_v29 = vpop.permute.xlu0 %1300  ;;  %v1189_v16 = vmax.f32 %v1101_v25, 0.0  ;;  %v1192_v57 = vmax.f32 %v1114_v47, 0.0 }
 0x217   :  { %v1620_v46 = vpop.f32.mrf.mxu1  ;;  %v1191_v17 = vmax.f32 %v1109_v31, 0.0  ;;  %v1122_v41 = vadd.f32 %v1615_v59, %v2432_v49  ;;  %v1125_v4 = vadd.f32 %v1618_v8, %v2434_v12  ;;  %v2600_v12 = vld [vmem:[#allocation7_spill] sm:$0xff] }
 0x218   :  { %v1185_v0 = vmax.f32 %v1085_v1, 0.0  ;;  %v1407_v18 = vadd.f32 %v1406_v53, %v1376_v48  ;;  %v1381_v51 = vmul.f32 %v2514_v60, %v1189_v16  ;;  %v1621_v56 = vadd.f32 %v1620_v46, %v1619_v63  ;;  %v1316_v61 = vpop.permute.xlu1 %1315  ;;  %v2604_v8 = vld [vmem:[#allocation11_spill] sm:$0xff] }
 0x219   :  { %v1622_v11 = vpop.f32.mrf.mxu1  ;;  %v1383_v55 = vmul.f32 %v2528_v10, %v1191_v17  ;;  %v1194_v48 = vmax.f32 %v1122_v41, 0.0  ;;  %v1195_v22 = vmax.f32 %v1125_v4, 0.0  ;;  %v2606_v4 = vld [vmem:[#allocation13_spill] sm:$0xff] }
 0x21a   :  { %v1377_v6 = vmul.f32 %v2488_v40, %v1185_v0  ;;  %v1612_v40 = vadd.f32 %v2512_v36, %v2509_v14  ;;  %v1311_v24 = vpop.permute.xlu0 %1310  ;;  %v1382_v36 = vmul.f32 %v2519_v5, %v1190_v52  ;;  %v1384_v5 = vmul.f32 %v2536_v13, %v1192_v57 }
 0x21b   :  { %v1623_v30 = vpop.f32.mrf.mxu1  ;;  %v1130_v49 = vadd.f32 %v1621_v56, %v2599_v26  ;;  %v1386_v21 = vmul.f32 %v1301_v29, %v1194_v48  ;;  %v2607_v26 = vld [vmem:[#allocation14_spill] sm:$0xff] }
 0x21c   :  { %v1408_v7 = vadd.f32 %v1407_v18, %v1377_v6  ;;  %v1117_v62 = vadd.f32 %v1612_v40, %v2430_v32  ;;  %v1624_v15 = vadd.f32 %v1623_v30, %v1622_v11  ;;  %v1326_v10 = vpop.permute.xlu1 %1325  ;;  %v1387_v30 = vmul.f32 %v1306_v35, %v1195_v22 }
 0x21d   :  { %v1625_v50 = vpop.f32.mrf.mxu1  ;;  %v1196_v6 = vmax.f32 %v1130_v49, 0.0 }
 0x21e   :  { %v1409_v23 = vadd.f32 %v1408_v7, %v1378_v19  ;;  %v1193_v34 = vmax.f32 %v1117_v62, 0.0  ;;  %v1321_v42 = vpop.permute.xlu0 %1320  ;;  %v1133_v53 = vadd.f32 %v1624_v15, %v2600_v12  ;;  %v2602_v7 = vld [vmem:[#allocation9_spill] sm:$0xff] }
 0x21f   :  { %v1626_v28 = vpop.f32.mrf.mxu1  ;;  %v1388_v40 = vmul.f32 %v1311_v24, %v1196_v6 }
 0x220   :  { %v1410_v33 = vadd.f32 %v1409_v23, %v1379_v37  ;;  %v1627_v32 = vadd.f32 %v1626_v28, %v1625_v50  ;;  %v1385_v46 = vmul.f32 %v1296_v43, %v1193_v34  ;;  %v1197_v9 = vmax.f32 %v1133_v53, 0.0  ;;  %v2603_v23 = vld [vmem:[#allocation10_spill] sm:$0xff] }
 0x221   :  { %v1628_v20 = vpop.f32.mrf.mxu1 }
 0x222   :  { %v1411_v14 = vadd.f32 %v1410_v33, %v1380_v3  ;;  %v1138_v25 = vadd.f32 %v1627_v32, %v2601_v45  ;;  %v1331_v13 = vpop.permute.xlu0 %1330  ;;  %v1336_v3 = vpop.permute.xlu1 %1335  ;;  %v1389_v59 = vmul.f32 %v1316_v61, %v1197_v9 }
 0x223   :  { %v1629_v54 = vpop.f32.mrf.mxu1 }
 0x224   :  { %v1412_v27 = vadd.f32 %v1411_v14, %v1381_v51  ;;  %v1630_v0 = vadd.f32 %v1629_v54, %v1628_v20  ;;  %v1198_v50 = vmax.f32 %v1138_v25, 0.0  ;;  %v2608_v25 = vld [vmem:[#allocation15_spill] sm:$0xff] }
 0x225   :  { %v1631_v38 = vpop.f32.mrf.mxu1 }
 0x226   :  { %v1413_v60 = vadd.f32 %v1412_v27, %v1382_v36  ;;  %v1141_v37 = vadd.f32 %v1630_v0, %v2602_v7  ;;  %v1341_v20 = vpop.permute.xlu0 %1340  ;;  %v1390_v51 = vmul.f32 %v1321_v42, %v1198_v50  ;;  %v2605_v36 = vld [vmem:[#allocation12_spill] sm:$0xff] }
 0x227   :  { %v1632_v2 = vpop.f32.mrf.mxu1 }
 0x228   :  { %v1414_v1 = vadd.f32 %v1413_v60, %v1383_v55  ;;  %v1633_v44 = vadd.f32 %v1632_v2, %v1631_v38  ;;  %v1199_v33 = vmax.f32 %v1141_v37, 0.0  ;;  %v1346_v55 = vpop.permute.xlu1 %1345 }
 0x229   :  { %v1634_v63 = vpop.f32.mrf.mxu1 }
 0x22a   :  { %v1415_v58 = vadd.f32 %v1414_v1, %v1384_v5  ;;  %v1146_v52 = vadd.f32 %v1633_v44, %v2603_v23  ;;  %v1391_v27 = vmul.f32 %v1326_v10, %v1199_v33  ;;  %v848_v2 = vpop.permute.xlu0 %847 }
 0x22b   :  { %v1635_v11 = vpop.f32.mrf.mxu1 }
 0x22c   :  { %v1416_v18 = vadd.f32 %v1415_v58, %v1385_v46  ;;  %v1636_v43 = vadd.f32 %v1635_v11, %v1634_v63  ;;  %v1200_v14 = vmax.f32 %v1146_v52, 0.0  ;;  %v1351_v12 = vpop.permute.xlu1 %1350 }
 0x22d   :  { %v1637_v19 = vpop.f32.mrf.mxu1 }
 0x22e   :  { %v1417_v39 = vadd.f32 %v1416_v18, %v1386_v21  ;;  %v1149_v35 = vadd.f32 %v1636_v43, %v2604_v8  ;;  %v1392_v60 = vmul.f32 %v1331_v13, %v1200_v14  ;;  %v853_v21 = vpop.permute.xlu0 %852 }
 0x22f   :  { %v1638_v16 = vpop.f32.mrf.mxu1 }
 0x230   :  { %v1418_v31 = vadd.f32 %v1417_v39, %v1387_v30  ;;  %v1639_v28 = vadd.f32 %v1638_v16, %v1637_v19  ;;  %v1201_v56 = vmax.f32 %v1149_v35, 0.0  ;;  %v1356_v9 = vpop.permute.xlu1 %1355 }
 0x231   :  { %v1640_v29 = vpop.f32.mrf.mxu1 }
 0x232   :  { %v1419_v47 = vadd.f32 %v1418_v31, %v1388_v40  ;;  %v1154_v54 = vadd.f32 %v1639_v28, %v2605_v36  ;;  %v1393_v48 = vmul.f32 %v1336_v3, %v1201_v56  ;;  %v1361_v31 = vpop.permute.xlu0 %1360 }
 0x233   :  { %v1641_v17 = vpop.f32.mrf.mxu1 }
 0x234   :  { %v1420_v62 = vadd.f32 %v1419_v47, %v1389_v59  ;;  %v1642_v57 = vadd.f32 %v1641_v17, %v1640_v29  ;;  %v1202_v15 = vmax.f32 %v1154_v54, 0.0  ;;  %v1366_v3 = vpop.permute.xlu1 %1365  ;;  %v1442_v59 = vlaneseq }
 0x235   :  { %v1643_v41 = vpop.f32.mrf.mxu1 }
 0x236   :  { %v1421_v24 = vadd.f32 %v1420_v62, %v1390_v51  ;;  %v1157_v38 = vadd.f32 %v1642_v57, %v2606_v4  ;;  %v1394_v46 = vmul.f32 %v1341_v20, %v1202_v15  ;;  %v1443_v35 = vshrl.u32 %v1442_v59, 7  ;;  %v1440_v14 = vpop.permute.xlu0 %1439 }
 0x237   :  { %v1644_v34 = vpop.f32.mrf.mxu1 }
 0x238   :  { %v1422_v61 = vadd.f32 %v1421_v24, %v1391_v27  ;;  %v1645_v32 = vadd.f32 %v1644_v34, %v1643_v41  ;;  %v1203_v1 = vmax.f32 %v1157_v38, 0.0  ;;  %v1444_v17 = vsub.s32 0, %v1443_v35 }
 0x239   :  { %v1646_v42 = vpop.f32.mrf.mxu1 }
 0x23a   :  { %v1423_v5 = vadd.f32 %v1422_v61, %v1392_v60  ;;  %v1162_v49 = vadd.f32 %v1645_v32, %v2607_v26  ;;  %v1395_v10 = vmul.f32 %v1346_v55, %v1203_v1  ;;  %v1445_v54 = vrot.slane %v1440_v14, %v1444_v17 }
 0x23b   :  { %v1647_v22 = vpop.f32.mrf.mxu1 }
 0x23c   :  { %v1424_v63 = vadd.f32 %v1423_v5, %v1393_v48  ;;  %v1648_v58 = vadd.f32 %v1647_v22, %v1646_v42  ;;  %v1204_v45 = vmax.f32 %v1162_v49, 0.0 }
 0x23d   :  { %v1649_v53 = vpop.f32.mrf.mxu1 }
 0x23e   :  { %v1425_v0 = vadd.f32 %v1424_v63, %v1394_v46  ;;  %v1165_v11 = vadd.f32 %v1648_v58, %v2608_v25  ;;  %v1396_v19 = vmul.f32 %v1351_v12, %v1204_v45 }
 0x23f   :  { %v1650_v18 = vpop.f32.mrf.mxu1 }
 0x240   :  { %v1426_v6 = vadd.f32 %v1425_v0, %v1395_v10  ;;  %v1205_v44 = vmax.f32 %v1165_v11, 0.0  ;;  %v1651_v13 = vadd.f32 %v1650_v18, %v1649_v53 }
 0x241   :  { %v1652_v30 = vpop.f32.mrf.mxu1 }
 0x242   :  { %v1170_v39 = vadd.f32 %v1651_v13, %v848_v2  ;;  %v1427_v37 = vadd.f32 %v1426_v6, %v1396_v19  ;;  %v1397_v43 = vmul.f32 %v1356_v9, %v1205_v44 }
 0x243   :  { %v1653_v7 = vpop.f32.mrf.mxu1 }
 0x244   :  { %v1206_v50 = vmax.f32 %v1170_v39, 0.0  ;;  %v1654_v16 = vadd.f32 %v1653_v7, %v1652_v30  ;;  %v1428_v52 = vadd.f32 %v1427_v37, %v1397_v43 }
 0x246   :  { %v1398_v40 = vmul.f32 %v1361_v31, %v1206_v50  ;;  %v1173_v23 = vadd.f32 %v1654_v16, %v853_v21 }
 0x248   :  { %v1207_v28 = vmax.f32 %v1173_v23, 0.0  ;;  %v1429_v29 = vadd.f32 %v1428_v52, %v1398_v40 }
 0x24a   :  { %v1399_v47 = vmul.f32 %v1366_v3, %v1207_v28 }
 0x24c   :  { %v1430_v33 = vadd.f32 %v1429_v29, %v1399_v47 }
 0x24e   :  { %v1431_v8 = vrot.slane %v1430_v33, 4 }
 0x250   :  { %v1432_v20 = vadd.f32 %v1431_v8, %v1430_v33 }
 0x252   :  { %v1433_v51 = vrot.slane %v1432_v20, 2 }
 0x254   :  { %v1434_v62 = vadd.f32 %v1433_v51, %v1432_v20 }
 0x256   :  { %v1435_v36 = vrot.slane %v1434_v62, 1 }
 0x258   :  { %v1436_v57 = vadd.f32 %v1435_v36, %v1434_v62 }
 0x25a   :  { %v1446_v41 = vadd.f32 %v1445_v54, %v1436_v57 }
 0x25c   :  { %1447 = vst [vmem:[#allocation3] sm:$0x1] %v1446_v41 }
 0x25d   :  { %1785 = shalt.err (!%p1782_p4)
}
 0x25e   :  { %1457 = dma.vmem_to_hbm [thread:$0]  %s1455_s21, 16, %s2588_s7, [#allocation4]  }
 0x25f   :  { %1794 = dma.done.wait [#allocation4], 16  }
 0x260   :  { %1795 = vsyncadd [#allocation4], 4294967280 }
 0x261   :  { %1461 = vsyncpa [#allocation4], 1 }

</bundles_post_ra>
